<compile_context>
chip_gen: v7x
topology: tpu7x:2x2x1
jax: 0.10.0
libtpu: 0.0.40
codegen_flags: <defaults>
</compile_context>

<pallas_src>
import functools
import math

import jax
import jax.numpy as jnp
from jax.experimental import pallas as pl
from jax.experimental.pallas import tpu as pltpu


_LANE = 128
_SUBLANE = 8
_MAX_SPATIAL_TILE = 2048          # lanes per block (HBM-roofline plateau)
_TARGET_STEP_IN_BYTES = 2 << 20   # aim for >= ~2 MiB of input moved per grid step
_MIN_PALLAS_ELEMS = 1 << 16       # below this, fused XLA beats kernel dispatch


def _round_up(v, m):
    return -(-v // m) * m


def _cdiv(a, b):
    return -(-a // b)


def _vmem_budget_and_limit():
    """Generation-aware double-buffered working-set budget + scoped-VMEM limit."""
    try:
        cap = int(pltpu.get_tpu_info().vmem_capacity_bytes)
    except Exception:
        cap = 64 << 20                       # assume the smallest (v7x per-TC VMEM)
    budget = min(24 << 20, (cap * 3) // 8)   # ~24 MiB on v5e/v6e/v7x
    limit = min(cap - (8 << 20), 2 * budget)  # explicit scoped-VMEM request
    return int(budget), int(limit)


def _pick_tiles(pre, red, post, in_bytes, out_bytes, in_is_f32, budget):
    """Choose (p_tile, r_tile, t_s).

    t_s   : lane axis, multiple of 128, kept wide (128-lane tiles only hit ~30%
            of HBM roofline; 512-2048 hits ~85%).
    r_tile: reduction rows per block; the full `red` when it fits, otherwise a
            multiple of 8 (the grid gets a red axis; remainder masked in-kernel).
    p_tile: batched pre-rows so each grid step moves >= ~2 MiB of input.
    """
    f32_mult = 1 if in_is_f32 else 2          # cast temp + square temp for non-f32
    t_s = min(_round_up(post, _LANE), _MAX_SPATIAL_TILE)
    p_min = pre if pre < _SUBLANE else _SUBLANE

    def working_set(p, r, t):
        in_blk = p * r * t * in_bytes
        f32_tmp = p * r * t * 4 * f32_mult
        out_blk = p * t * out_bytes
        acc = p * t * 4
        return 2 * in_blk + f32_tmp + 2 * out_blk + acc

    # Reduction tile: prefer splitting `red` over a grid axis to shrinking t_s.
    while True:
        per_row = p_min * t_s * (2 * in_bytes + 4 * f32_mult)
        other = p_min * t_s * (2 * out_bytes + 4)
        r_fit = (budget - other) // per_row if budget > other else 0
        if r_fit >= red:
            r_t = red                         # full extent: no divisibility rule
            break
        r_t = (int(r_fit) // _SUBLANE) * _SUBLANE
        if r_t >= _SUBLANE or t_s <= _LANE:
            r_t = max(_SUBLANE, r_t)
            break
        t_s = max(_LANE, (t_s // 2 // _LANE) * _LANE)

    # Pre tile: amortize the fixed per-step cost, stay inside the budget.
    per_p = working_set(1, r_t, t_s)
    p_fit = max(1, budget // per_p)
    p_want = max(1, _TARGET_STEP_IN_BYTES // max(1, r_t * t_s * in_bytes))
    p_t = min(pre, max(p_min, min(p_want, p_fit)))
    if p_t < pre:
        p_t = max(_SUBLANE, (p_t // _SUBLANE) * _SUBLANE)   # out-block sublane rule
    return int(p_t), int(r_t), int(t_s)


def _l2norm_kernel(x_ref, o_ref, acc_ref, *, red, r_tile):
    """x_ref: (p_t, r_blk, t_s); o_ref: (p_t, t_s); acc_ref: (p_t, t_s) f32."""
    r = pl.program_id(2)

    @pl.when(r == 0)
    def _init():
        acc_ref[...] = jnp.zeros_like(acc_ref)

    x = x_ref[...].astype(jnp.float32)         # (p_t, r_blk, t_s)
    sq = x * x
    if red % r_tile:
        # Last red block is partial: Pallas leaves the trailing rows of the VMEM
        # buffer undefined, so select them away before accumulating.
        row = jax.lax.broadcasted_iota(jnp.int32, (r_tile, 1), 0) + r * r_tile
        sq = jnp.where((row < red)[None], sq, 0.0)

    # Sum over the reduction rows: group-of-8 sublane adds are VPU work; the
    # single cross-sublane reduce per lane tile is cheap XLU filler.
    acc_ref[...] += jnp.sum(sq, axis=1)

    @pl.when(r == pl.num_programs(2) - 1)
    def _finalize():
        o_ref[...] = jnp.sqrt(acc_ref[...]).astype(o_ref.dtype)


def l2_norm(x, dim=1, keepdim=False, force_pallas=False, max_red_tile=None):
    """Equivalent of torch.norm(x, p=2, dim=dim, keepdim=keepdim)."""
    shape = x.shape
    dim = dim % len(shape)
    pre = int(math.prod(shape[:dim]))
    red = int(shape[dim])
    post = int(math.prod(shape[dim + 1:]))

    if keepdim:
        out_shape = tuple(d if i != dim else 1 for i, d in enumerate(shape))
    else:
        out_shape = tuple(d for i, d in enumerate(shape) if i != dim)

    # Tiny problems / lane-starved layouts: plain XLA fusion wins.
    if not force_pallas and (x.size < _MIN_PALLAS_ELEMS or post < _LANE):
        x32 = x.astype(jnp.float32)
        return jnp.sqrt(jnp.sum(x32 * x32, axis=dim, keepdims=keepdim)).astype(x.dtype)

    budget, vmem_limit = _vmem_budget_and_limit()
    xr = x.reshape(pre, red, post)                      # contiguous reshape: free
    p_t, r_t, t_s = _pick_tiles(pre, red, post, xr.dtype.itemsize,
                                xr.dtype.itemsize, xr.dtype == jnp.float32, budget)
    if max_red_tile is not None and max_red_tile < r_t:  # testing hook
        r_t = max(_SUBLANE, (int(max_red_tile) // _SUBLANE) * _SUBLANE)

    n_pre, n_sp = _cdiv(pre, p_t), _cdiv(post, t_s)
    if n_pre * n_sp == 1 and post > _LANE:
        # v7x megacore: make sure there are >= 2 parallel blocks to split.
        t_s = _round_up(_cdiv(post, 2), _LANE)
        n_sp = _cdiv(post, t_s)
    n_red = _cdiv(red, r_t)

    kernel = functools.partial(_l2norm_kernel, red=red, r_tile=r_t)
    out = pl.pallas_call(
        kernel,
        out_shape=jax.ShapeDtypeStruct((pre, post), x.dtype),
        grid_spec=pltpu.PrefetchScalarGridSpec(
            num_scalar_prefetch=0,
            grid=(n_pre, n_sp, n_red),
            in_specs=[pl.BlockSpec((p_t, r_t, t_s), lambda p, s, r: (p, r, s))],
            out_specs=pl.BlockSpec((p_t, t_s), lambda p, s, r: (p, s)),
            scratch_shapes=[pltpu.VMEM((p_t, t_s), jnp.float32)],
        ),
        compiler_params=pltpu.CompilerParams(
            dimension_semantics=("parallel", "parallel", "arbitrary"),
            vmem_limit_bytes=int(vmem_limit),
        ),
    )(xr)
    return out.reshape(out_shape)


if __name__ == "__main__":
    key = jax.random.PRNGKey(0)

    # Module config: torch.norm(x, p=2, dim=1, keepdim=...)
    N, C, H, W = 2, 4, 16, 16
    x = jax.random.normal(key, (N, C, H, W), dtype=jnp.float32)

    # Small test shape -> force the Pallas path so the kernel actually runs.
    y = l2_norm(x, dim=1, keepdim=False, force_pallas=True)
    y_keep = l2_norm(x, dim=1, keepdim=True, force_pallas=True)
    jax.block_until_ready((y, y_keep))

    ref = jnp.sqrt(jnp.sum(x * x, axis=1))
    assert y.shape == (N, H, W)
    assert y_keep.shape == (N, 1, H, W)
    assert jnp.allclose(y, ref, rtol=1e-5, atol=1e-5)
    assert jnp.allclose(y_keep[:, 0], ref, rtol=1e-5, atol=1e-5)

    # Multi-tile spatial grid + partial (masked) trailing lane block, no HBM pad
    # (post = 2880 is not a multiple of the 2048-lane tile).
    x2 = jax.random.normal(jax.random.PRNGKey(1), (2, 5, 40, 72), dtype=jnp.float32)
    y2 = l2_norm(x2, dim=1, keepdim=False, force_pallas=True)
    jax.block_until_ready(y2)
    ref2 = jnp.sqrt(jnp.sum(x2 * x2, axis=1))
    assert y2.shape == (2, 40, 72)
    assert jnp.allclose(y2, ref2, rtol=1e-5, atol=1e-5)

    # Reduction split over the "arbitrary" grid axis with a partial, masked last
    # red block (20 % 8 != 0) — exercises the accumulator init/finalize path.
    x3 = jax.random.normal(jax.random.PRNGKey(2), (2, 20, 8, 32), dtype=jnp.float32)
    y3 = l2_norm(x3, dim=1, keepdim=False, force_pallas=True, max_red_tile=8)
    jax.block_until_ready(y3)
    ref3 = jnp.sqrt(jnp.sum(x3 * x3, axis=1))
    assert y3.shape == (2, 8, 32)
    assert jnp.allclose(y3, ref3, rtol=1e-5, atol=1e-5)

    # Default (gated) path on the tiny shape takes the XLA fallback; must agree too.
    y_gate = l2_norm(x, dim=1, keepdim=False)
    assert jnp.allclose(y_gate, ref, rtol=1e-5, atol=1e-5)

    print("KERNEL_OK")
</pallas_src>

<mosaic_0001>
module attributes {stable_mosaic.version = 11 : i64} {
  func.func @_l2norm_kernel(%arg0: i32, %arg1: i32, %arg2: i32, %arg3: memref<2x4x128xf32, #tpu.memory_space<vmem>>, %arg4: memref<2x128xf32, #tpu.memory_space<vmem>>, %arg5: memref<2x128xf32, #tpu.memory_space<vmem>>) attributes {dimension_semantics = [#tpu.dimension_semantics<parallel>, #tpu.dimension_semantics<parallel>, #tpu.dimension_semantics<arbitrary>], iteration_bounds = array<i64: 1, 2, 1>, scalar_prefetch = 0 : i64, scratch_operands = 1 : i64, tpu.core_type = #tpu.core_type<tc>, window_params = [{transform_indices = @transform_0, window_bounds = array<i64: 2, 4, 128>}, {transform_indices = @transform_1, window_bounds = array<i64: 2, 128>}]} {
    %c0_i32 = arith.constant 0 : i32
    %0 = arith.cmpi eq, %arg2, %c0_i32 : i32
    %1 = arith.extui %0 : i1 to i32
    %c0_i32_0 = arith.constant 0 : i32
    %2 = arith.cmpi ne, %1, %c0_i32_0 : i32
    scf.if %2 {
      %cst_9 = arith.constant 0.000000e+00 : f32
      %12 = vector.broadcast %cst_9 : f32 to vector<2x128xf32>
      %c0_10 = arith.constant 0 : index
      %c0_11 = arith.constant 0 : index
      %13 = vector.load %arg5[%c0_10, %c0_11] : memref<2x128xf32, #tpu.memory_space<vmem>>, vector<2x128xf32>
      tpu.vector_store %arg5[%c0_10, %c0_11], %12 {strides = array<i32>} : memref<2x128xf32, #tpu.memory_space<vmem>>, vector<2x128xf32>,
    } else {
    }
    %c0 = arith.constant 0 : index
    %c0_1 = arith.constant 0 : index
    %c0_2 = arith.constant 0 : index
    %3 = vector.load %arg3[%c0, %c0_1, %c0_2] : memref<2x4x128xf32, #tpu.memory_space<vmem>>, vector<2x4x128xf32>
    %4 = arith.mulf %3, %3 : vector<2x4x128xf32>
    %c0_3 = arith.constant 0 : index
    %c0_4 = arith.constant 0 : index
    %5 = vector.load %arg5[%c0_3, %c0_4] : memref<2x128xf32, #tpu.memory_space<vmem>>, vector<2x128xf32>
    %cst = arith.constant dense<0.000000e+00> : vector<2x128xf32>
    %6 = vector.multi_reduction <add>, %4, %cst [1] : vector<2x4x128xf32> to vector<2x128xf32>
    %7 = arith.addf %5, %6 : vector<2x128xf32>
    %c0_5 = arith.constant 0 : index
    %c0_6 = arith.constant 0 : index
    %8 = vector.load %arg5[%c0_5, %c0_6] : memref<2x128xf32, #tpu.memory_space<vmem>>, vector<2x128xf32>
    tpu.vector_store %arg5[%c0_5, %c0_6], %7 {strides = array<i32>} : memref<2x128xf32, #tpu.memory_space<vmem>>, vector<2x128xf32>,
    %c0_i32_7 = arith.constant 0 : i32
    %9 = arith.cmpi eq, %arg2, %c0_i32_7 : i32
    %10 = arith.extui %9 : i1 to i32
    %c0_i32_8 = arith.constant 0 : i32
    %11 = arith.cmpi ne, %10, %c0_i32_8 : i32
    scf.if %11 {
      %c0_9 = arith.constant 0 : index
      %c0_10 = arith.constant 0 : index
      %12 = vector.load %arg5[%c0_9, %c0_10] : memref<2x128xf32, #tpu.memory_space<vmem>>, vector<2x128xf32>
      %13 = math.sqrt %12 : vector<2x128xf32>
      %c0_11 = arith.constant 0 : index
      %c0_12 = arith.constant 0 : index
      %14 = vector.load %arg4[%c0_11, %c0_12] : memref<2x128xf32, #tpu.memory_space<vmem>>, vector<2x128xf32>
      tpu.vector_store %arg4[%c0_11, %c0_12], %13 {strides = array<i32>} : memref<2x128xf32, #tpu.memory_space<vmem>>, vector<2x128xf32>,
    } else {
    }
    return
  }
  func.func @transform_0(%arg0: i32, %arg1: i32, %arg2: i32) -> (i32, i32, i32) {
    %c0_i32 = arith.constant 0 : i32
    return %arg0, %arg2, %arg1 : i32, i32, i32
  }
  func.func @transform_1(%arg0: i32, %arg1: i32, %arg2: i32) -> (i32, i32) {
    %c0_i32 = arith.constant 0 : i32
    return %arg0, %arg1 : i32, i32
  }
}

</mosaic_0001>

<bundles_post_ra>
// kernel: tpu_custom_call.1
= control target key start
LH: loop header
LB: loop body
LE: loop exit
PB: predicated region body
PF: predicated region fallthrough
CT: control target
= control target key end

     0   :  { %6 = vsyncpa [#allocation4], 0  ;;  %s695_s0 = inlined_call_operand.hbm [shape: f32[2,4,256], index: 0, kind: input, shape index: {}]   ;;  %s696_s1 = inlined_call_operand.hbm [shape: f32[2,256], index: 1, kind: output, shape index: {}]  }
   0x1   :  { %8 = vsyncpa [#allocation4 + $0x1], 0 }
   0x2   :  { %9 = vsyncpa [#allocation5], 0 }
   0x3   :  { %11 = vsyncpa [#allocation5 + $0x1], 0  ;;  %s523_s6 = smov 0   ;;  %s525_s7 = smov 0  }
   0x4   :  { %s527_s8 = smov 0   ;;  %s529_s9 = smov 0  }
   0x5   :  { %s531_s10 = smov 0   ;;  %s533_s11 = smov 0  }
   0x6 LB: > { %s312_s12 = sadd.s32 4294967295, %s505_s11   ;;  %s313_s13 = sadd.s32 4294967294, %s505_s11   ;;  %s505_s11 = sphi %s533_s11, %s17_s11   ;;  %s501_s10 = sphi %s531_s10, %s710_s10   ;;  %s497_s9 = sphi %s529_s9, %s709_s9   ;;  %s493_s8 = sphi %s527_s8, %s708_s8   ;;  %s489_s7 = sphi %s525_s7, %s707_s7   ;;  %s485_s6 = sphi %s523_s6, %s706_s6  }
   0x7   : > { %s32_s14 = sadd.s32 1, %s501_s10  ;;  %s47_s15 = sadd.s32 1, %s493_s8 }
   0x8   : > { %p34_p0 = scmp.ge.s32.totalorder %s32_s14, 2  ;;  %p54_p1 = scmp.ne.s32.totalorder %s493_s8, %s489_s7 }
   0x9   : > { %p55_p2 = scmp.eq.s32.totalorder %s505_s11, 0  ;;  %p60_p3 = scmp.ne.s32.totalorder %s489_s7, %s485_s6 }
   0xa   : > { %s712_s14 = smov (%p34_p0, %s32_s14), 0  ;;  %p61_p5 = scmp.eq.s32.totalorder %s312_s12, 0 }
   0xb   : > { %p564_p4 = por %p55_p2, %p54_p1  ;;  %s43_s17 = ssub.s32 %s501_s10, %s712_s14 }
   0xc   : > { %p86_p6 = scmp.eq.s32.totalorder %s312_s12, 1  ;;  %p45_p7 = scmp.eq.s32.totalorder %s43_s17, 0 }
   0xd   : > { %p570_p8 = por %p61_p5, %p60_p3  ;;  %p92_p10 = scmp.eq.s32.totalorder %s313_s13, 1 }
   0xe   : > { %p574_p9 = por %p86_p6, %p54_p1  ;;  %p337_p13 = scmp.lt.s32.totalorder %s505_s11, 2 }
   0xf   : > { %s579_s20 = scalar_select %p45_p7, %s493_s8, %s47_s15  }
  0x10   : > { %s700_s19 = scalar_select %p574_p9, 1, 0 }
  0x11   : > { %p581_p11 = por %p92_p10, %p60_p3  ;;  %s112_s22 = sand.u32 1, %s493_s8  }
  0x12   : > { %s316_s23 = sshll.u32 %s112_s22, 3  ;;  %s317_s24 = sshll.u32 %s501_s10, 6 }
  0x13   : > { %s701_s21 = scalar_select %p581_p11, 1, 0 }
  0x14   : > { %s592_s27 = scalar_lea.hbm %s695_s0, %s317_s24  ;;  %s116_s28 = scalar_lea.vmem [#allocation3], %s316_s23 }
  0x15   : > { %s127_s29 = sshll.u32 %s116_s28, 4  ;;  %p598_p0 = pnand %p337_p13, %p564_p4  ;;  %s594_s29 = int_to_ptr.vmem [resolvable:$true] %s127_s29 }
  0x16   : > { %s602_s2 = scalar_lea.sflag [#allocation4], %s112_s22  ;;  %s393_s3 = scalar_lea.hbm %s592_s27, 128 }
  0x17   : > { %p394_p1 = scmp.ne.s32.totalorder %s592_s27, %s393_s3  ;;  %p395_p2 = pneg %p598_p0 }
  0x18   : > { %s398_s12 = scalar_lea.hbm %s695_s0, 256  ;;  %p399_p4 = scmp.lt.u32.totalorder %s592_s27, %s695_s0 }
  0x19   : > { %p396_p3 = pnand %p395_p2, %p394_p1  ;;  %p400_p6 = scmp.lt.u32.totalorder %s398_s12, %s393_s3 }
  0x1a   : > { %p402_p10 = scmp.lt.u32.totalorder %s393_s3, %s592_s27 }
  0x1b   : > { %p397_p5 = pneg %p396_p3  ;;  %p401_p7 = por %p400_p6, %p399_p4 }
  0x1d   : > { %p403_p13 = por %p402_p10, %p401_p7 }
  0x1f   : > { %p404_p12 = pnand %p403_p13, %p397_p5 }
  0x21   : > { %407 = shalt.err (!%p404_p12)
}
  0x22   : > { %s408_s16 = scalar_lea.vmem %s594_s29, 128  ;;  %s507_s17 = smov [#allocation3]  }
  0x23   : > { %p409_p1 = scmp.ne.s32.totalorder %s594_s29, %s408_s16  ;;  %s413_s22 = sshll.u32 %s507_s17, 4  ;;  %s414_s22 = int_to_ptr.vmem [resolvable:$false] %s413_s22 }
  0x24   : > { %s415_s23 = scalar_lea.vmem %s414_s22, 256  ;;  %p416_p9 = scmp.lt.s32.totalorder %s594_s29, %s414_s22 }
  0x25   : > { %p411_p3 = pnand %p409_p1, %p395_p2  ;;  %p417_p4 = scmp.lt.s32.totalorder %s415_s23, %s408_s16 }
  0x27   : > { %p412_p11 = pneg %p411_p3  ;;  %p418_p6 = por %p417_p4, %p416_p9 }
  0x29   : > { %p419_p7 = pnand %p418_p6, %p412_p11 }
  0x2b   : > { %422 = shalt.err (!%p419_p7)
}
  0x2c   : > { %s508_s24 = smov 128   ;;  %s509_s25 = smov 64  }
  0x2d   : > { %s510_s26 = smov 4   ;;  %p318_p12 = scmp.ge.s32.totalorder %s505_s11, 1 }
  0x2e   : > { %332 = dma.hbm_to_vmem [thread:$0]  (!%p598_p0), %s592_s27, 128, %s594_s29, %s602_s2, %s508_s24, %s509_s25, %s510_s26  }
  0x2f   : > { %p135_p2 = scmp.lt.s32.totalorder %s505_s11, 3 }
  0x31   : > { %p136_p5 = pnand %p318_p12, %p135_p2 }
  0x32   : > { %s633_s28 = sand.u32 (!%p136_p5), 1, %s489_s7  }
  0x33   : > { %139 = sbr.rel (%p136_p5) target bundleno = 115 (0x73), region = 24  ;;  %s319_s3 = sshll.u32 (!%p136_p5), %s633_s28, 3 }
  0x34   : > { %s142_s4 = scalar_lea.sflag (!%p136_p5), [#allocation4], %s633_s28  ;;  %s145_s5 = scalar_lea.vmem (!%p136_p5), [#allocation3], %s319_s3 }
  0x3a   : > { %476 = dma.done.wait (%p570_p8), %s142_s4, 128  }
  0x3b   : > { %478 = vsyncadd (%p570_p8), %s142_s4, 4294967168  ;;  %v511_v0 = vmov 0.0   ;;  %v170_v1 = vld [vmem:[%s145_s5] sm:$0xf]  ;;  %v171_v2 = vld [vmem:[%s145_s5 + $0x4] sm:$0xf] }
  0x3c   : > { %169 = vst [vmem:[#allocation2] sm:$0x3] %v511_v0  ;;  %vm175_vm0 = vcmask 1043456   ;;  %v172_v3 = vmul.f32 %v170_v1, %v170_v1  ;;  %v173_v4 = vmul.f32 %v171_v2, %v171_v2  ;;  %vm192_vm1 = vcmask 1041409   ;;  %s320_s18 = sshll.u32 %s633_s28, 1  ;;  %s322_s30 = sshll.u32 %s497_s9, 5 }
  0x3d   : > { %s163_s27 = scalar_lea.vmem [#allocation6], %s320_s18  ;;  %s648_s13 = scalar_lea.hbm %s696_s1, %s322_s30 }
  0x3e   : > { %v176_v5 = vsel %vm175_vm0, %v172_v3, 0.0  ;;  %v183_v6 = vsel %vm175_vm0, %v173_v4, 0.0  ;;  %s225_s29 = sshll.u32 %s163_s27, 4  ;;  %s210_s15 = scalar_lea.sflag [#allocation5], %s633_s28  ;;  %s643_s29 = int_to_ptr.vmem [resolvable:$true] %s225_s29 }
  0x3f   : > { %v177_v7 = vrot.slane %v176_v5, 4  ;;  %v184_v8 = vrot.slane %v183_v6, 4  ;;  %s423_s16 = scalar_lea.vmem %s643_s29, 32  ;;  %p703_p9 = scmp.ne.s32.totalorder %s700_s19, 0 }
  0x40   : > { %p424_p8 = scmp.ne.s32.totalorder %s643_s29, %s423_s16  ;;  %s512_s9 = smov [#allocation6]  }
  0x41   : > { %v178_v9 = vadd.f32 %v177_v7, %v176_v5  ;;  %v185_v10 = vadd.f32 %v184_v8, %v183_v6  ;;  %s427_s17 = sshll.u32 %s512_s9, 4  ;;  %s428_s17 = int_to_ptr.vmem [resolvable:$false] %s427_s17 }
  0x42   : > { %p425_p11 = pnand %p424_p8, %p703_p9  ;;  %s429_s22 = scalar_lea.vmem %s428_s17, 64 }
  0x43   : > { %v179_v11 = vrot.slane %v178_v9, 2  ;;  %v186_v12 = vrot.slane %v185_v10, 2  ;;  %v174_v17 = vld [vmem:[#allocation2] sm:$0x3]  ;;  %p430_p10 = scmp.lt.s32.totalorder %s643_s29, %s428_s17  ;;  %p431_p13 = scmp.lt.s32.totalorder %s429_s22, %s423_s16 }
  0x44   : > { %p426_p0 = pneg %p425_p11 }
  0x45   : > { %v180_v13 = vadd.f32 %v179_v11, %v178_v9  ;;  %v187_v14 = vadd.f32 %v186_v12, %v185_v10  ;;  %p432_p1 = por %p431_p13, %p430_p10 }
  0x47   : > { %v181_v15 = vrot.slane %v180_v13, 1  ;;  %v188_v16 = vrot.slane %v187_v14, 1  ;;  %p433_p3 = pnand %p432_p1, %p426_p0 }
  0x49   : > { %v182_v18 = vadd.f32 %v181_v15, %v180_v13  ;;  %v189_v19 = vadd.f32 %v188_v16, %v187_v14 }
  0x4b   : > { %v193_v20 = vsel %vm192_vm1, %v189_v19, %v182_v18 }
  0x4c   : > { %v195_v21 = vadd.f32 %v193_v20, %v174_v17 }
  0x4e   : > { %196 = vst [vmem:[#allocation2] sm:$0x3] %v195_v21 }
  0x55   : > { %v200_v22 = vld [vmem:[#allocation2] sm:$0x3] }
  0x56   : > { %391 = vrsqrt.f32 %v200_v22  ;;  %vm203_vm2 = vcmp.eq.f32.partialorder %v200_v22, inf  ;;  %v206_v25 = vand.u32 2147483648, %v200_v22  ;;  %vm205_vm3 = vcmp.eq.f32.partialorder %v200_v22, 0.0 }
  0x60   : > { %v392_v23 = vpop.eup %391 }
  0x61   : > { %v202_v24 = vmul.f32 %v392_v23, %v200_v22 }
  0x63   : > { %v204_v26 = vsel %vm203_vm2, %v200_v22, %v202_v24 }
  0x64   : > { %v207_v27 = vsel %vm205_vm3, %v206_v25, %v204_v26 }
  0x65   : > { %208 = vst [vmem:[%s163_s27] sm:$0x3] %v207_v27 }
  0x66   : > { %436 = shalt.err (!%p433_p3)
}
  0x67   : > { %s437_s23 = scalar_lea.hbm %s648_s13, 32  ;;  %s441_s26 = scalar_lea.hbm %s696_s1, 64 }
  0x68   : > { %p438_p4 = scmp.ne.s32.totalorder %s648_s13, %s437_s23  ;;  %p442_p12 = scmp.lt.u32.totalorder %s648_s13, %s696_s1 }
  0x69   : > { %p443_p2 = scmp.lt.u32.totalorder %s441_s26, %s437_s23  ;;  %p445_p8 = scmp.lt.u32.totalorder %s437_s23, %s648_s13 }
  0x6a   : > { %p439_p6 = pnand %p438_p4, %p703_p9 }
  0x6b   : > { %p444_p5 = por %p443_p2, %p442_p12 }
  0x6c   : > { %p440_p7 = pneg %p439_p6 }
  0x6d   : > { %p446_p11 = por %p445_p8, %p444_p5 }
  0x6f   : > { %p447_p0 = pnand %p446_p11, %p440_p7 }
  0x71   : > { %450 = shalt.err (!%p447_p0)
}
  0x72   : > { %327 = dma.vmem_to_hbm [thread:$0]  (%p703_p9), %s643_s29, 32, %s648_s13, %s210_s15  }
  0x73 PF: > { %s237_s4 = sand.u32 1, %s485_s6   ;;  %p704_p10 = scmp.ne.s32.totalorder %s701_s21, 0 }
  0x74   : > { %p705_p13 = scmp.ge.s32.totalorder %s505_s11, 2  ;;  %s238_s5 = scalar_lea.sflag [#allocation5], %s237_s4 }
  0x76   : > { %p334_p1 = pnand %p705_p13, %p704_p10 }
  0x78   : > { %480 = dma.done.wait (!%p334_p1), %s238_s5, 32  }
  0x79   : > { %482 = vsyncadd (!%p334_p1), %s238_s5, 4294967264  ;;  %s17_s11 = sadd.s32 1, %s505_s11   ;;  %s706_s6 = smov %s489_s7 }
  0x7a   : > { %p14_p3 = scmp.ge.s32.totalorder %s17_s11, 4   ;;  %s707_s7 = smov %s493_s8 }
  0x7b   : > { %s708_s8 = smov %s579_s20  ;;  %s709_s9 = smov %s501_s10 }
  0x7c   : > { %s710_s10 = smov %s712_s14  ;;  %16 = sbr.rel (!%p14_p3) target bundleno = 6 (0x6), region = 77 }
  0x83   :  { %243 = vsyncpa [#allocation4], 1 }
  0x84   :  { %245 = vsyncpa [#allocation4 + $0x1], 1 }
  0x85   :  { %246 = vsyncpa [#allocation5], 1 }
  0x86   :  { %248 = vsyncpa [#allocation5 + $0x1], 1 }

</bundles_post_ra>
